<compile_context>
chip_gen: v5e
topology: v5e:2x2
jax: 0.10.0
libtpu: 0.0.40
codegen_flags: <defaults>
</compile_context>

<pallas_src>
import functools

import jax
import jax.numpy as jnp
from jax.experimental import pallas as pl
from jax.experimental.pallas import tpu as pltpu

_LANES = 128
_MAX_ROWS_PER_TILE = 512  # packed rows per output block (multiple of 8/16)


def _view_token_kernel(tok_ref, out_ref, *, rep):
    # tok_ref: (1, dim) VMEM (resident across grid steps).
    # out_ref: (TB, rep*dim) VMEM tile -> lane-dense when rep*dim % 128 == 0.
    tok = tok_ref[...].astype(out_ref.dtype)          # cast once: (1, dim)
    if rep > 1:
        # Pack `rep` identical batch rows into one full-128-lane row so the
        # store path uses unmasked full-width vector stores.
        tok = jnp.concatenate([tok] * rep, axis=-1)   # (1, rep*dim)
    out_ref[...] = jnp.broadcast_to(tok, out_ref.shape)


def view_token_network(x, view_token):
    """Pallas implementation of ViewTokenNetwork.forward.

    x:           any array whose leading axis is the batch (e.g. NCHW images).
    view_token:  (1, dim) parameter.
    returns:     (B, dim) array with dtype == x.dtype.
    """
    B = x.shape[0]
    dim = view_token.shape[1]
    out_dtype = x.dtype

    # Lane-dense packing factor: how many batch rows fit in one 128-lane row.
    rep = _LANES // dim if (dim < _LANES and _LANES % dim == 0) else 1
    lane_width = rep * dim
    rows = pl.cdiv(B, rep)  # packed rows actually needed

    if rows <= _MAX_ROWS_PER_TILE:
        tb = rows                      # single block == full array dims (OK)
        rows_padded = rows
    else:
        tb = _MAX_ROWS_PER_TILE        # aligned, pipelined writeback
        rows_padded = pl.cdiv(rows, tb) * tb
    grid = rows_padded // tb

    kernel = functools.partial(_view_token_kernel, rep=rep)

    bytes_accessed = int(
        rows_padded * lane_width * jnp.dtype(out_dtype).itemsize
        + dim * view_token.dtype.itemsize
    )

    packed = pl.pallas_call(
        kernel,
        out_shape=jax.ShapeDtypeStruct((rows_padded, lane_width), out_dtype),
        grid_spec=pltpu.PrefetchScalarGridSpec(
            num_scalar_prefetch=0,
            grid=(grid,),
            # Constant index_map -> token stays resident in VMEM, no per-tile DMA.
            in_specs=[pl.BlockSpec((1, dim), lambda i: (0, 0))],
            out_specs=pl.BlockSpec((tb, lane_width), lambda i: (i, 0)),
        ),
        compiler_params=pltpu.CompilerParams(
            dimension_semantics=("parallel",),
        ),
        cost_estimate=pl.CostEstimate(
            flops=0, transcendentals=0, bytes_accessed=bytes_accessed),
    )(view_token)

    # Unpack the lane-dense slab back to (B, dim). Every row holds the same
    # token, so the reshape/slice is pure layout plumbing.
    out = packed[:rows].reshape(rows * rep, dim)[:B]
    return out


if __name__ == "__main__":
    key = jax.random.PRNGKey(0)
    k_x, k_tok = jax.random.split(key)

    B, C, H, W = 2, 4, 16, 16
    dim = 32

    x = jax.random.normal(k_x, (B, C, H, W), dtype=jnp.float32)
    view_token = jax.random.normal(k_tok, (1, dim), dtype=jnp.float32)

    out = jax.block_until_ready(view_token_network(x, view_token))

    # Reference: broadcast of view_token to (B, dim) in x's dtype.
    ref = (jnp.ones((B, 1), dtype=x.dtype) * view_token).astype(x.dtype)
    assert out.shape == (B, dim), out.shape
    assert out.dtype == x.dtype, out.dtype
    assert jnp.allclose(out, ref), "mismatch vs reference"

    print("KERNEL_OK")
</pallas_src>

<mosaic_0001>
module attributes {stable_mosaic.version = 11 : i64} {
  func.func @_view_token_kernel(%arg0: i32, %arg1: memref<1x32xf32, #tpu.memory_space<vmem>>, %arg2: memref<1x128xf32, #tpu.memory_space<vmem>>) attributes {dimension_semantics = [#tpu.dimension_semantics<parallel>], iteration_bounds = array<i64: 1>, scalar_prefetch = 0 : i64, scratch_operands = 0 : i64, tpu.core_type = #tpu.core_type<tc>, window_params = [{pipeline_mode = #tpu.pipeline_mode<synchronous>, transform_indices = @transform_0, window_bounds = array<i64: 1, 32>}, {transform_indices = @transform_1, window_bounds = array<i64: 1, 128>}]} {
    %c0 = arith.constant 0 : index
    %c0_0 = arith.constant 0 : index
    %0 = vector.load %arg1[%c0, %c0_0] : memref<1x32xf32, #tpu.memory_space<vmem>>, vector<1x32xf32>
    %1 = tpu.concatenate %0, %0, %0, %0 in 1 : vector<1x32xf32>, vector<1x32xf32>, vector<1x32xf32>, vector<1x32xf32> -> vector<1x128xf32>
    %c0_1 = arith.constant 0 : index
    %c0_2 = arith.constant 0 : index
    %2 = vector.load %arg2[%c0_1, %c0_2] : memref<1x128xf32, #tpu.memory_space<vmem>>, vector<1x128xf32>
    tpu.vector_store %arg2[%c0_1, %c0_2], %1 {strides = array<i32>} : memref<1x128xf32, #tpu.memory_space<vmem>>, vector<1x128xf32>,
    return
  }
  func.func @transform_0(%arg0: i32) -> (i32, i32) {
    %c0_i32 = arith.constant 0 : i32
    %c0_i32_0 = arith.constant 0 : i32
    %c0_i32_1 = arith.constant 0 : i32
    return %c0_i32, %c0_i32_0 : i32, i32
  }
  func.func @transform_1(%arg0: i32) -> (i32, i32) {
    %c0_i32 = arith.constant 0 : i32
    %c0_i32_0 = arith.constant 0 : i32
    return %arg0, %c0_i32 : i32, i32
  }
}

</mosaic_0001>

<bundles_post_ra>
// kernel: tpu_custom_call.1
= control target key start
LH: loop header
LB: loop body
LE: loop exit
PB: predicated region body
PF: predicated region fallthrough
CT: control target
= control target key end

     0   :  { %6 = vsyncpa [#allocation3], 0  ;;  %s138_s0 = inlined_call_operand.hbm [shape: f32[1,32], index: 0, kind: input, shape index: {}]   ;;  %s139_s1 = inlined_call_operand.hbm [shape: f32[1,128], index: 1, kind: output, shape index: {}]  }
   0x1   :  { %7 = vsyncpa [#allocation4], 0  ;;  %s13_s8 = sshll.u32 %s138_s0, 4  ;;  %s117_s9 = smov [#allocation2]   ;;  %s14_s8 = int_to_ptr.hbm [resolvable:$true] %s13_s8 }
   0x2   :  { %s15_s10 = sshll.u32 %s117_s9, 4  ;;  %s16_s10 = int_to_ptr.vmem [resolvable:$true] %s15_s10 }
   0x3   :  { %18 = dma.hbm_to_vmem [thread:$0]  %s14_s8, 16, %s16_s10, [#allocation3]  }
   0x4   :  { %113 = dma.done.wait [#allocation3], 16  }
   0x5   :  { %114 = vsyncadd [#allocation3], 4294967280  ;;  %v64_v0 = vld [vmem:[#allocation2] ss:$0 sm:$0xff]  ;;  %s118_s11 = smov 32   ;;  %s119_s12 = smov 96  }
   0x6   :  { %26 = vrot.lane.b32.xlu0 %v64_v0, %s118_s11  ;;  %32 = vrot.lane.b32.xlu1 %v64_v0, %s119_s12  ;;  %s120_s13 = smov 64   ;;  %v23_v2 = vld [vmem:[#allocation2] sm:$0x1]  ;;  %vm35_vm0 = vcmask 261120   ;;  %vm37_vm1 = vcmask 523264   ;;  %s121_s14 = smov [#allocation5]  }
   0x7   :  { %s47_s0 = sshll.u32 %s121_s14, 4  ;;  %s49_s17 = sshll.u32 %s139_s1, 4  ;;  %vm39_vm2 = vcmask 785408   ;;  %s48_s0 = int_to_ptr.vmem [resolvable:$true] %s47_s0  ;;  %s50_s17 = int_to_ptr.hbm [resolvable:$true] %s49_s17 }
   0xe   :  { %29 = vrot.lane.b32.xlu0 %v64_v0, %s120_s13 }
  0x78   :  { %v27_v1 = vpop.permute.xlu0 %26  ;;  %v33_v3 = vpop.permute.xlu1 %32 }
  0x79   :  { %v36_v4 = vsel %vm35_vm0, %v23_v2, %v27_v1 }
  0x80   :  { %v30_v5 = vpop.permute.xlu0 %29 }
  0x81   :  { %v38_v6 = vsel %vm37_vm1, %v36_v4, %v30_v5 }
  0x82   :  { %v40_v7 = vsel %vm39_vm2, %v38_v6, %v33_v3 }
  0x83   :  { %41 = vst [vmem:[#allocation5] sm:$0x1] %v40_v7 }
  0x84   :  { %52 = dma.vmem_to_hbm [thread:$0]  %s48_s0, 16, %s50_s17, [#allocation4]  }
  0x85   :  { %115 = dma.done.wait [#allocation4], 16  }
  0x86   :  { %116 = vsyncadd [#allocation4], 4294967280 }
  0x87   :  { %57 = vsyncpa [#allocation3], 1 }
  0x88   :  { %58 = vsyncpa [#allocation4], 1 }

</bundles_post_ra>
